<compile_context>
chip_gen: v7x
topology: tpu7x:2x2x1
jax: 0.10.0
libtpu: 0.0.40
codegen_flags: <defaults>
</compile_context>

<pallas_src>
import jax
import jax.numpy as jnp
from jax import lax
from jax.experimental import pallas as pl
from jax.experimental.pallas import tpu as pltpu


# ----------------------------- Pallas kernel ------------------------------ #
def _conv3x3_s2_tap_kernel(x_ref, w_ref, b_ref, *o_refs):
    """3x3 / stride-2 / pad-1 conv for one batch element x one Cout block.

    x_ref : (1, 4, Ho+1, Wo+1, Cin)  stride-2 phase decomposition of the padded
                                     input; phase = 2*(row parity) + col parity.
    w_ref : (3, 3, Cin, TCo)         conv weights   (VMEM resident across grid)
    b_ref : (1, TCo)                 f32 bias       (VMEM resident across grid)
    o_refs[0] : (1, Ho, Wo, TCo)     conv output (caller dtype)
    o_refs[1] : (1, Ho, Wo, TCo)     optional relu(conv) in compute dtype
    """
    _, Ho, Wo, Co = o_refs[0].shape
    Cin = x_ref.shape[-1]

    # 9-tap accumulation: tap (kh, kw) reads phase (kh%2, kw%2) at the
    # contiguous offset (kh//2, kw//2) -> no strided access, no im2col.
    acc = jnp.zeros((Ho * Wo, Co), jnp.float32)
    for kh in range(3):
        for kw in range(3):
            phase = (kh % 2) * 2 + (kw % 2)
            xt = x_ref[0, phase, pl.ds(kh // 2, Ho), pl.ds(kw // 2, Wo), :]
            acc = acc + jnp.dot(xt.reshape(Ho * Wo, Cin), w_ref[kh, kw],
                                preferred_element_type=jnp.float32)

    acc = acc + b_ref[...]                                   # f32 bias add
    o_refs[0][0] = acc.reshape(Ho, Wo, Co).astype(o_refs[0].dtype)
    if len(o_refs) > 1:                                      # fused ReLU output
        o_refs[1][0] = jnp.maximum(acc, 0.0).reshape(Ho, Wo, Co).astype(
            o_refs[1].dtype)


# ------------------------------ JAX wrapper -------------------------------- #
def conv3x3_s2_pallas(x_nhwc, w_kkio, bias, *, compute_dtype=jnp.bfloat16,
                      out_dtype=None, emit_relu=False):
    """3x3 stride-2 pad-1 conv via in-kernel 9-tap accumulation. NHWC in/out."""
    N, H, W, Cin = x_nhwc.shape
    Cout = w_kkio.shape[-1]
    out_dt = out_dtype if out_dtype is not None else x_nhwc.dtype
    cdt = compute_dtype if compute_dtype is not None else x_nhwc.dtype
    Ho, Wo = (H + 1) // 2, (W + 1) // 2

    # Pad to the exact window extent and split into the 4 stride-2 phases
    # (space-to-depth).  Tap (kh, kw) then reads phase (kh%2, kw%2) at the
    # contiguous offset (kh//2, kw//2): one light XLA pass over the input
    # instead of a 9x im2col expansion.
    xp = jnp.pad(x_nhwc.astype(cdt),
                 ((0, 0), (1, 2 * Ho + 1 - H), (1, 2 * Wo + 1 - W), (0, 0)))
    xph = xp.reshape(N, Ho + 1, 2, Wo + 1, 2, Cin)
    xph = xph.transpose(0, 2, 4, 1, 3, 5).reshape(N, 4, Ho + 1, Wo + 1, Cin)

    w2 = w_kkio.astype(cdt)                                  # (3, 3, Cin, Cout)
    b2 = bias.astype(jnp.float32).reshape(1, Cout)

    # Cout blocking: 256 feeds the v6e/v7x 2x256x256 MXU at full column width;
    # 128 matches v5e's 4x128x128; small Cout stays un-blocked (full-dim block).
    if Cout % 256 == 0:
        tco = 256
    elif Cout % 128 == 0:
        tco = 128
    else:
        tco = Cout
    grid = (N, Cout // tco)

    if emit_relu:
        out_shape = (jax.ShapeDtypeStruct((N, Ho, Wo, Cout), out_dt),
                     jax.ShapeDtypeStruct((N, Ho, Wo, Cout), cdt))
        out_specs = (pl.BlockSpec((1, Ho, Wo, tco), lambda b, c: (b, 0, 0, c)),
                     pl.BlockSpec((1, Ho, Wo, tco), lambda b, c: (b, 0, 0, c)))
    else:
        out_shape = jax.ShapeDtypeStruct((N, Ho, Wo, Cout), out_dt)
        out_specs = pl.BlockSpec((1, Ho, Wo, tco), lambda b, c: (b, 0, 0, c))

    itemsize = jnp.dtype(cdt).itemsize
    out_bytes = N * Ho * Wo * Cout * jnp.dtype(out_dt).itemsize
    if emit_relu:
        out_bytes += N * Ho * Wo * Cout * itemsize
    bytes_accessed = int(xph.size * itemsize + w2.size * itemsize
                         + b2.size * 4 + out_bytes)
    flops = 2 * N * Ho * Wo * 9 * Cin * Cout

    outs = pl.pallas_call(
        _conv3x3_s2_tap_kernel,
        out_shape=out_shape,
        grid=grid,
        in_specs=[
            pl.BlockSpec((1, 4, Ho + 1, Wo + 1, Cin),
                         lambda b, c: (b, 0, 0, 0, 0)),       # per-batch phases
            pl.BlockSpec((3, 3, Cin, tco), lambda b, c: (0, 0, 0, c)),  # weights
            pl.BlockSpec((1, tco), lambda b, c: (0, c)),                # bias
        ],
        out_specs=out_specs,
        compiler_params=pltpu.CompilerParams(
            dimension_semantics=("parallel", "parallel")),
        cost_estimate=pl.CostEstimate(flops=flops, transcendentals=0,
                                      bytes_accessed=bytes_accessed),
    )(xph, w2, b2)
    return outs


# --------------------------- Module: FPNTopP6P7 ---------------------------- #
def init_fpn_params(key, in_channel, out_channel, dtype=jnp.float32):
    """kaiming_uniform_(a=1) for weights (bound = sqrt(3/fan_in)), zero bias."""
    k6, k7 = jax.random.split(key)
    b6 = (3.0 / (in_channel * 9)) ** 0.5
    b7 = (3.0 / (out_channel * 9)) ** 0.5
    # stored (kh, kw, Cin, Cout) so per-tap slices match the kernel's layout
    w6 = jax.random.uniform(k6, (3, 3, in_channel, out_channel), dtype, -b6, b6)
    w7 = jax.random.uniform(k7, (3, 3, out_channel, out_channel), dtype, -b7, b7)
    return {
        "w6": w6, "b6": jnp.zeros((out_channel,), dtype),
        "w7": w7, "b7": jnp.zeros((out_channel,), dtype),
    }


def fpn_top_p6_p7(f5, p5, params, use_p5=True, compute_dtype=jnp.bfloat16):
    """Forward pass. f5/p5 are NCHW (like PyTorch); outputs are NCHW."""
    x_nchw = p5 if use_p5 else f5
    out_dt = x_nchw.dtype
    x = jnp.transpose(x_nchw, (0, 2, 3, 1))                  # -> NHWC
    # First conv also emits relu(p6) in the compute dtype (fused in-kernel),
    # which is exactly F.relu(p6) fed to the second conv.
    p6_nhwc, p6_relu = conv3x3_s2_pallas(
        x, params["w6"], params["b6"], compute_dtype=compute_dtype,
        out_dtype=out_dt, emit_relu=True)
    p7_nhwc = conv3x3_s2_pallas(
        p6_relu, params["w7"], params["b7"], compute_dtype=compute_dtype,
        out_dtype=out_dt, emit_relu=False)
    p6 = jnp.transpose(p6_nhwc, (0, 3, 1, 2))                # -> NCHW
    p7 = jnp.transpose(p7_nhwc, (0, 3, 1, 2))
    return p6, p7


# ------------------------------ Reference ---------------------------------- #
def _conv_ref_nchw(x_nchw, w_kkio, bias, compute_dtype=None, stride=2):
    """lax.conv reference (NCHW), weight given as (kh, kw, Cin, Cout)."""
    cdt = compute_dtype if compute_dtype is not None else x_nchw.dtype
    w_oihw = jnp.transpose(w_kkio, (3, 2, 0, 1)).astype(cdt)
    y = lax.conv_general_dilated(
        x_nchw.astype(cdt), w_oihw, window_strides=(stride, stride),
        padding=((1, 1), (1, 1)),
        dimension_numbers=("NCHW", "OIHW", "NCHW"),
        preferred_element_type=jnp.float32)
    y = y + bias[None, :, None, None].astype(jnp.float32)
    return y.astype(x_nchw.dtype)


def _fpn_ref(f5, p5, params, use_p5=True, compute_dtype=None):
    x = p5 if use_p5 else f5
    p6 = _conv_ref_nchw(x, params["w6"], params["b6"], compute_dtype)
    p7 = _conv_ref_nchw(jnp.maximum(p6, 0.0), params["w7"], params["b7"],
                        compute_dtype)
    return p6, p7


# --------------------------------- Main ------------------------------------ #
if __name__ == "__main__":
    key = jax.random.PRNGKey(0)
    k_param, k_f5, k_p5 = jax.random.split(key, 3)

    batch, in_channel, out_channel, spatial = 2, 4, 8, 16
    params = init_fpn_params(k_param, in_channel, out_channel)

    f5 = jax.random.normal(k_f5, (batch, in_channel, spatial, spatial),
                           jnp.float32)
    p5 = jax.random.normal(k_p5, (batch, in_channel, spatial, spatial),
                           jnp.float32)

    # 1) f32 compute path: near-exact check against the lax.conv reference.
    p6, p7 = fpn_top_p6_p7(f5, p5, params, use_p5=True, compute_dtype=None)
    jax.block_until_ready((p6, p7))
    p6_ref, p7_ref = _fpn_ref(f5, p5, params, use_p5=True, compute_dtype=None)
    assert p6.shape == (batch, out_channel, spatial // 2, spatial // 2)
    assert p7.shape == (batch, out_channel, spatial // 4, spatial // 4)
    assert jnp.allclose(p6, p6_ref, atol=1e-4, rtol=1e-4)
    assert jnp.allclose(p7, p7_ref, atol=1e-4, rtol=1e-4)

    # 2) bf16 MXU path (production default): compare vs bf16-operand reference.
    p6_bf, p7_bf = fpn_top_p6_p7(f5, p5, params, use_p5=True,
                                 compute_dtype=jnp.bfloat16)
    jax.block_until_ready((p6_bf, p7_bf))
    p6_bref, p7_bref = _fpn_ref(f5, p5, params, use_p5=True,
                                compute_dtype=jnp.bfloat16)
    assert jnp.allclose(p6_bf, p6_bref, atol=5e-2, rtol=5e-2)
    assert jnp.allclose(p7_bf, p7_bref, atol=5e-2, rtol=5e-2)

    print("KERNEL_OK")
</pallas_src>

<mosaic_0001>
module attributes {stable_mosaic.version = 11 : i64} {
  func.func @_conv3x3_s2_tap_kernel(%arg0: i32, %arg1: i32, %arg2: memref<1x4x9x9x4xf32, #tpu.memory_space<vmem>>, %arg3: memref<3x3x4x8xf32, #tpu.memory_space<vmem>>, %arg4: memref<1x8xf32, #tpu.memory_space<vmem>>, %arg5: memref<1x8x8x8xf32, #tpu.memory_space<vmem>>, %arg6: memref<1x8x8x8xf32, #tpu.memory_space<vmem>>) attributes {dimension_semantics = [#tpu.dimension_semantics<parallel>, #tpu.dimension_semantics<parallel>], iteration_bounds = array<i64: 2, 1>, scalar_prefetch = 0 : i64, scratch_operands = 0 : i64, tpu.core_type = #tpu.core_type<tc>, window_params = [{transform_indices = @transform_0, window_bounds = array<i64: 1, 4, 9, 9, 4>}, {transform_indices = @transform_1, window_bounds = array<i64: 3, 3, 4, 8>}, {transform_indices = @transform_2, window_bounds = array<i64: 1, 8>}, {transform_indices = @transform_3, window_bounds = array<i64: 1, 8, 8, 8>}, {transform_indices = @transform_4, window_bounds = array<i64: 1, 8, 8, 8>}]} {
    %cst = arith.constant 0.000000e+00 : f32
    %0 = vector.broadcast %cst : f32 to vector<64x8xf32>
    %c0 = arith.constant 0 : index
    %c0_0 = arith.constant 0 : index
    %c0_1 = arith.constant 0 : index
    %c0_2 = arith.constant 0 : index
    %c0_3 = arith.constant 0 : index
    %1 = vector.load %arg2[%c0, %c0_0, %c0_1, %c0_2, %c0_3] : memref<1x4x9x9x4xf32, #tpu.memory_space<vmem>>, vector<1x1x8x8x4xf32>
    %2 = vector.shape_cast %1 : vector<1x1x8x8x4xf32> to vector<8x8x4xf32>
    %3 = vector.shape_cast %2 : vector<8x8x4xf32> to vector<64x4xf32>
    %c0_4 = arith.constant 0 : index
    %c0_5 = arith.constant 0 : index
    %c0_6 = arith.constant 0 : index
    %c0_7 = arith.constant 0 : index
    %4 = vector.load %arg3[%c0_4, %c0_5, %c0_6, %c0_7] : memref<3x3x4x8xf32, #tpu.memory_space<vmem>>, vector<1x1x4x8xf32>
    %5 = vector.shape_cast %4 : vector<1x1x4x8xf32> to vector<4x8xf32>
    %cst_8 = arith.constant dense<0.000000e+00> : vector<64x8xf32>
    %6 = tpu.matmul %3, %5, %cst_8 {dimension_numbers = #tpu.dot_dimension_numbers<[1], [0], [0], [1], [0, 0, 1, 1], [], []>} : vector<64x4xf32>, vector<4x8xf32>, vector<64x8xf32> -> vector<64x8xf32>
    %7 = arith.addf %0, %6 : vector<64x8xf32>
    %c0_9 = arith.constant 0 : index
    %c1 = arith.constant 1 : index
    %c0_10 = arith.constant 0 : index
    %c0_11 = arith.constant 0 : index
    %c0_12 = arith.constant 0 : index
    %8 = vector.load %arg2[%c0_9, %c1, %c0_10, %c0_11, %c0_12] : memref<1x4x9x9x4xf32, #tpu.memory_space<vmem>>, vector<1x1x8x8x4xf32>
    %9 = vector.shape_cast %8 : vector<1x1x8x8x4xf32> to vector<8x8x4xf32>
    %10 = vector.shape_cast %9 : vector<8x8x4xf32> to vector<64x4xf32>
    %c0_13 = arith.constant 0 : index
    %c1_14 = arith.constant 1 : index
    %c0_15 = arith.constant 0 : index
    %c0_16 = arith.constant 0 : index
    %11 = vector.load %arg3[%c0_13, %c1_14, %c0_15, %c0_16] : memref<3x3x4x8xf32, #tpu.memory_space<vmem>>, vector<1x1x4x8xf32>
    %12 = vector.shape_cast %11 : vector<1x1x4x8xf32> to vector<4x8xf32>
    %cst_17 = arith.constant dense<0.000000e+00> : vector<64x8xf32>
    %13 = tpu.matmul %10, %12, %cst_17 {dimension_numbers = #tpu.dot_dimension_numbers<[1], [0], [0], [1], [0, 0, 1, 1], [], []>} : vector<64x4xf32>, vector<4x8xf32>, vector<64x8xf32> -> vector<64x8xf32>
    %14 = arith.addf %7, %13 : vector<64x8xf32>
    %c0_18 = arith.constant 0 : index
    %c0_19 = arith.constant 0 : index
    %c0_20 = arith.constant 0 : index
    %c1_21 = arith.constant 1 : index
    %c0_22 = arith.constant 0 : index
    %15 = vector.load %arg2[%c0_18, %c0_19, %c0_20, %c1_21, %c0_22] : memref<1x4x9x9x4xf32, #tpu.memory_space<vmem>>, vector<1x1x8x8x4xf32>
    %16 = vector.shape_cast %15 : vector<1x1x8x8x4xf32> to vector<8x8x4xf32>
    %17 = vector.shape_cast %16 : vector<8x8x4xf32> to vector<64x4xf32>
    %c0_23 = arith.constant 0 : index
    %c2 = arith.constant 2 : index
    %c0_24 = arith.constant 0 : index
    %c0_25 = arith.constant 0 : index
    %18 = vector.load %arg3[%c0_23, %c2, %c0_24, %c0_25] : memref<3x3x4x8xf32, #tpu.memory_space<vmem>>, vector<1x1x4x8xf32>
    %19 = vector.shape_cast %18 : vector<1x1x4x8xf32> to vector<4x8xf32>
    %cst_26 = arith.constant dense<0.000000e+00> : vector<64x8xf32>
    %20 = tpu.matmul %17, %19, %cst_26 {dimension_numbers = #tpu.dot_dimension_numbers<[1], [0], [0], [1], [0, 0, 1, 1], [], []>} : vector<64x4xf32>, vector<4x8xf32>, vector<64x8xf32> -> vector<64x8xf32>
    %21 = arith.addf %14, %20 : vector<64x8xf32>
    %c0_27 = arith.constant 0 : index
    %c2_28 = arith.constant 2 : index
    %c0_29 = arith.constant 0 : index
    %c0_30 = arith.constant 0 : index
    %c0_31 = arith.constant 0 : index
    %22 = vector.load %arg2[%c0_27, %c2_28, %c0_29, %c0_30, %c0_31] : memref<1x4x9x9x4xf32, #tpu.memory_space<vmem>>, vector<1x1x8x8x4xf32>
    %23 = vector.shape_cast %22 : vector<1x1x8x8x4xf32> to vector<8x8x4xf32>
    %24 = vector.shape_cast %23 : vector<8x8x4xf32> to vector<64x4xf32>
    %c1_32 = arith.constant 1 : index
    %c0_33 = arith.constant 0 : index
    %c0_34 = arith.constant 0 : index
    %c0_35 = arith.constant 0 : index
    %25 = vector.load %arg3[%c1_32, %c0_33, %c0_34, %c0_35] : memref<3x3x4x8xf32, #tpu.memory_space<vmem>>, vector<1x1x4x8xf32>
    %26 = vector.shape_cast %25 : vector<1x1x4x8xf32> to vector<4x8xf32>
    %cst_36 = arith.constant dense<0.000000e+00> : vector<64x8xf32>
    %27 = tpu.matmul %24, %26, %cst_36 {dimension_numbers = #tpu.dot_dimension_numbers<[1], [0], [0], [1], [0, 0, 1, 1], [], []>} : vector<64x4xf32>, vector<4x8xf32>, vector<64x8xf32> -> vector<64x8xf32>
    %28 = arith.addf %21, %27 : vector<64x8xf32>
    %c0_37 = arith.constant 0 : index
    %c3 = arith.constant 3 : index
    %c0_38 = arith.constant 0 : index
    %c0_39 = arith.constant 0 : index
    %c0_40 = arith.constant 0 : index
    %29 = vector.load %arg2[%c0_37, %c3, %c0_38, %c0_39, %c0_40] : memref<1x4x9x9x4xf32, #tpu.memory_space<vmem>>, vector<1x1x8x8x4xf32>
    %30 = vector.shape_cast %29 : vector<1x1x8x8x4xf32> to vector<8x8x4xf32>
    %31 = vector.shape_cast %30 : vector<8x8x4xf32> to vector<64x4xf32>
    %c1_41 = arith.constant 1 : index
    %c1_42 = arith.constant 1 : index
    %c0_43 = arith.constant 0 : index
    %c0_44 = arith.constant 0 : index
    %32 = vector.load %arg3[%c1_41, %c1_42, %c0_43, %c0_44] : memref<3x3x4x8xf32, #tpu.memory_space<vmem>>, vector<1x1x4x8xf32>
    %33 = vector.shape_cast %32 : vector<1x1x4x8xf32> to vector<4x8xf32>
    %cst_45 = arith.constant dense<0.000000e+00> : vector<64x8xf32>
    %34 = tpu.matmul %31, %33, %cst_45 {dimension_numbers = #tpu.dot_dimension_numbers<[1], [0], [0], [1], [0, 0, 1, 1], [], []>} : vector<64x4xf32>, vector<4x8xf32>, vector<64x8xf32> -> vector<64x8xf32>
    %35 = arith.addf %28, %34 : vector<64x8xf32>
    %c0_46 = arith.constant 0 : index
    %c2_47 = arith.constant 2 : index
    %c0_48 = arith.constant 0 : index
    %c1_49 = arith.constant 1 : index
    %c0_50 = arith.constant 0 : index
    %36 = vector.load %arg2[%c0_46, %c2_47, %c0_48, %c1_49, %c0_50] : memref<1x4x9x9x4xf32, #tpu.memory_space<vmem>>, vector<1x1x8x8x4xf32>
    %37 = vector.shape_cast %36 : vector<1x1x8x8x4xf32> to vector<8x8x4xf32>
    %38 = vector.shape_cast %37 : vector<8x8x4xf32> to vector<64x4xf32>
    %c1_51 = arith.constant 1 : index
    %c2_52 = arith.constant 2 : index
    %c0_53 = arith.constant 0 : index
    %c0_54 = arith.constant 0 : index
    %39 = vector.load %arg3[%c1_51, %c2_52, %c0_53, %c0_54] : memref<3x3x4x8xf32, #tpu.memory_space<vmem>>, vector<1x1x4x8xf32>
    %40 = vector.shape_cast %39 : vector<1x1x4x8xf32> to vector<4x8xf32>
    %cst_55 = arith.constant dense<0.000000e+00> : vector<64x8xf32>
    %41 = tpu.matmul %38, %40, %cst_55 {dimension_numbers = #tpu.dot_dimension_numbers<[1], [0], [0], [1], [0, 0, 1, 1], [], []>} : vector<64x4xf32>, vector<4x8xf32>, vector<64x8xf32> -> vector<64x8xf32>
    %42 = arith.addf %35, %41 : vector<64x8xf32>
    %c0_56 = arith.constant 0 : index
    %c0_57 = arith.constant 0 : index
    %c1_58 = arith.constant 1 : index
    %c0_59 = arith.constant 0 : index
    %c0_60 = arith.constant 0 : index
    %43 = vector.load %arg2[%c0_56, %c0_57, %c1_58, %c0_59, %c0_60] : memref<1x4x9x9x4xf32, #tpu.memory_space<vmem>>, vector<1x1x8x8x4xf32>
    %44 = vector.shape_cast %43 : vector<1x1x8x8x4xf32> to vector<8x8x4xf32>
    %45 = vector.shape_cast %44 : vector<8x8x4xf32> to vector<64x4xf32>
    %c2_61 = arith.constant 2 : index
    %c0_62 = arith.constant 0 : index
    %c0_63 = arith.constant 0 : index
    %c0_64 = arith.constant 0 : index
    %46 = vector.load %arg3[%c2_61, %c0_62, %c0_63, %c0_64] : memref<3x3x4x8xf32, #tpu.memory_space<vmem>>, vector<1x1x4x8xf32>
    %47 = vector.shape_cast %46 : vector<1x1x4x8xf32> to vector<4x8xf32>
    %cst_65 = arith.constant dense<0.000000e+00> : vector<64x8xf32>
    %48 = tpu.matmul %45, %47, %cst_65 {dimension_numbers = #tpu.dot_dimension_numbers<[1], [0], [0], [1], [0, 0, 1, 1], [], []>} : vector<64x4xf32>, vector<4x8xf32>, vector<64x8xf32> -> vector<64x8xf32>
    %49 = arith.addf %42, %48 : vector<64x8xf32>
    %c0_66 = arith.constant 0 : index
    %c1_67 = arith.constant 1 : index
    %c1_68 = arith.constant 1 : index
    %c0_69 = arith.constant 0 : index
    %c0_70 = arith.constant 0 : index
    %50 = vector.load %arg2[%c0_66, %c1_67, %c1_68, %c0_69, %c0_70] : memref<1x4x9x9x4xf32, #tpu.memory_space<vmem>>, vector<1x1x8x8x4xf32>
    %51 = vector.shape_cast %50 : vector<1x1x8x8x4xf32> to vector<8x8x4xf32>
    %52 = vector.shape_cast %51 : vector<8x8x4xf32> to vector<64x4xf32>
    %c2_71 = arith.constant 2 : index
    %c1_72 = arith.constant 1 : index
    %c0_73 = arith.constant 0 : index
    %c0_74 = arith.constant 0 : index
    %53 = vector.load %arg3[%c2_71, %c1_72, %c0_73, %c0_74] : memref<3x3x4x8xf32, #tpu.memory_space<vmem>>, vector<1x1x4x8xf32>
    %54 = vector.shape_cast %53 : vector<1x1x4x8xf32> to vector<4x8xf32>
    %cst_75 = arith.constant dense<0.000000e+00> : vector<64x8xf32>
    %55 = tpu.matmul %52, %54, %cst_75 {dimension_numbers = #tpu.dot_dimension_numbers<[1], [0], [0], [1], [0, 0, 1, 1], [], []>} : vector<64x4xf32>, vector<4x8xf32>, vector<64x8xf32> -> vector<64x8xf32>
    %56 = arith.addf %49, %55 : vector<64x8xf32>
    %c0_76 = arith.constant 0 : index
    %c0_77 = arith.constant 0 : index
    %c1_78 = arith.constant 1 : index
    %c1_79 = arith.constant 1 : index
    %c0_80 = arith.constant 0 : index
    %57 = vector.load %arg2[%c0_76, %c0_77, %c1_78, %c1_79, %c0_80] : memref<1x4x9x9x4xf32, #tpu.memory_space<vmem>>, vector<1x1x8x8x4xf32>
    %58 = vector.shape_cast %57 : vector<1x1x8x8x4xf32> to vector<8x8x4xf32>
    %59 = vector.shape_cast %58 : vector<8x8x4xf32> to vector<64x4xf32>
    %c2_81 = arith.constant 2 : index
    %c2_82 = arith.constant 2 : index
    %c0_83 = arith.constant 0 : index
    %c0_84 = arith.constant 0 : index
    %60 = vector.load %arg3[%c2_81, %c2_82, %c0_83, %c0_84] : memref<3x3x4x8xf32, #tpu.memory_space<vmem>>, vector<1x1x4x8xf32>
    %61 = vector.shape_cast %60 : vector<1x1x4x8xf32> to vector<4x8xf32>
    %cst_85 = arith.constant dense<0.000000e+00> : vector<64x8xf32>
    %62 = tpu.matmul %59, %61, %cst_85 {dimension_numbers = #tpu.dot_dimension_numbers<[1], [0], [0], [1], [0, 0, 1, 1], [], []>} : vector<64x4xf32>, vector<4x8xf32>, vector<64x8xf32> -> vector<64x8xf32>
    %63 = arith.addf %56, %62 : vector<64x8xf32>
    %c0_86 = arith.constant 0 : index
    %c0_87 = arith.constant 0 : index
    %64 = vector.load %arg4[%c0_86, %c0_87] : memref<1x8xf32, #tpu.memory_space<vmem>>, vector<1x8xf32>
    %65 = vector.broadcast %64 : vector<1x8xf32> to vector<64x8xf32>
    %66 = arith.addf %63, %65 : vector<64x8xf32>
    %67 = vector.shape_cast %66 : vector<64x8xf32> to vector<8x8x8xf32>
    %c0_88 = arith.constant 0 : index
    %c0_89 = arith.constant 0 : index
    %c0_90 = arith.constant 0 : index
    %c0_91 = arith.constant 0 : index
    %68 = vector.load %arg5[%c0_88, %c0_89, %c0_90, %c0_91] : memref<1x8x8x8xf32, #tpu.memory_space<vmem>>, vector<1x8x8x8xf32>
    %69 = vector.shape_cast %68 : vector<1x8x8x8xf32> to vector<8x8x8xf32>
    %70 = vector.shape_cast %67 : vector<8x8x8xf32> to vector<1x8x8x8xf32>
    tpu.vector_store %arg5[%c0_88, %c0_89, %c0_90, %c0_91], %70 {strides = array<i32>} : memref<1x8x8x8xf32, #tpu.memory_space<vmem>>, vector<1x8x8x8xf32>,
    %cst_92 = arith.constant 0.000000e+00 : f32
    %71 = vector.broadcast %cst_92 : f32 to vector<64x8xf32>
    %72 = arith.maximumf %66, %71 : vector<64x8xf32>
    %73 = vector.shape_cast %72 : vector<64x8xf32> to vector<8x8x8xf32>
    %c0_93 = arith.constant 0 : index
    %c0_94 = arith.constant 0 : index
    %c0_95 = arith.constant 0 : index
    %c0_96 = arith.constant 0 : index
    %74 = vector.load %arg6[%c0_93, %c0_94, %c0_95, %c0_96] : memref<1x8x8x8xf32, #tpu.memory_space<vmem>>, vector<1x8x8x8xf32>
    %75 = vector.shape_cast %74 : vector<1x8x8x8xf32> to vector<8x8x8xf32>
    %76 = vector.shape_cast %73 : vector<8x8x8xf32> to vector<1x8x8x8xf32>
    tpu.vector_store %arg6[%c0_93, %c0_94, %c0_95, %c0_96], %76 {strides = array<i32>} : memref<1x8x8x8xf32, #tpu.memory_space<vmem>>, vector<1x8x8x8xf32>,
    return
  }
  func.func @transform_0(%arg0: i32, %arg1: i32) -> (i32, i32, i32, i32, i32) {
    %c0_i32 = arith.constant 0 : i32
    %c0_i32_0 = arith.constant 0 : i32
    %c0_i32_1 = arith.constant 0 : i32
    %c0_i32_2 = arith.constant 0 : i32
    %c0_i32_3 = arith.constant 0 : i32
    return %arg0, %c0_i32, %c0_i32_0, %c0_i32_1, %c0_i32_2 : i32, i32, i32, i32, i32
  }
  func.func @transform_1(%arg0: i32, %arg1: i32) -> (i32, i32, i32, i32) {
    %c0_i32 = arith.constant 0 : i32
    %c0_i32_0 = arith.constant 0 : i32
    %c0_i32_1 = arith.constant 0 : i32
    %c0_i32_2 = arith.constant 0 : i32
    return %c0_i32, %c0_i32_0, %c0_i32_1, %arg1 : i32, i32, i32, i32
  }
  func.func @transform_2(%arg0: i32, %arg1: i32) -> (i32, i32) {
    %c0_i32 = arith.constant 0 : i32
    %c0_i32_0 = arith.constant 0 : i32
    return %c0_i32, %arg1 : i32, i32
  }
  func.func @transform_3(%arg0: i32, %arg1: i32) -> (i32, i32, i32, i32) {
    %c0_i32 = arith.constant 0 : i32
    %c0_i32_0 = arith.constant 0 : i32
    %c0_i32_1 = arith.constant 0 : i32
    return %arg0, %c0_i32, %c0_i32_0, %arg1 : i32, i32, i32, i32
  }
  func.func @transform_4(%arg0: i32, %arg1: i32) -> (i32, i32, i32, i32) {
    %c0_i32 = arith.constant 0 : i32
    %c0_i32_0 = arith.constant 0 : i32
    %c0_i32_1 = arith.constant 0 : i32
    return %arg0, %c0_i32, %c0_i32_0, %arg1 : i32, i32, i32, i32
  }
}

</mosaic_0001>

<bundles_post_ra>
// kernel: tpu_custom_call.1
= control target key start
LH: loop header
LB: loop body
LE: loop exit
PB: predicated region body
PF: predicated region fallthrough
CT: control target
= control target key end

     0   :  { %10 = vsyncpa [#allocation3], 0  ;;  %s2849_s0 = inlined_call_operand.vmem [shape: f32[2,4,9,9,4], index: 0, kind: input, shape index: {}]   ;;  %s2850_s1 = inlined_call_operand.vmem [shape: f32[3,3,4,8], index: 1, kind: input, shape index: {}]   ;;  %s2851_s2 = inlined_call_operand.vmem [shape: f32[1,8], index: 2, kind: input, shape index: {}]   ;;  %s2852_s3 = inlined_call_operand.hbm [shape: f32[2,8,8,8], index: 3, kind: output, shape index: {0}]   ;;  %s2853_s4 = inlined_call_operand.hbm [shape: f32[2,8,8,8], index: 4, kind: output, shape index: {1}]  }
   0x1   :  { %12 = vsyncpa [#allocation3 + $0x1], 0 }
   0x2   :  { %13 = vsyncpa [#allocation5], 0 }
   0x3   :  { %15 = vsyncpa [#allocation5 + $0x1], 0  ;;  %s2447_s15 = smov 0   ;;  %s2449_s16 = smov 0  }
   0x4   :  { %s2451_s17 = smov 0   ;;  %s2453_s18 = smov 0  }
   0x5   :  { %s2455_s19 = smov 0   ;;  %s2457_s20 = smov 0  }
   0x6 LB: > { %s1804_s21 = sadd.s32 4294967295, %s2416_s20   ;;  %s1805_s22 = sadd.s32 4294967294, %s2416_s20   ;;  %s2416_s20 = sphi %s2457_s20, %s21_s20   ;;  %s2412_s19 = sphi %s2455_s19, %s2860_s19   ;;  %s2408_s18 = sphi %s2453_s18, %s2859_s18   ;;  %s2404_s17 = sphi %s2451_s17, %s2858_s17   ;;  %s2400_s16 = sphi %s2449_s16, %s2857_s16   ;;  %s2396_s15 = sphi %s2447_s15, %s2856_s15  }
   0x7   : > { %s33_s23 = sadd.s32 1, %s2412_s19  ;;  %s120_s24 = sadd.s32 1, %s2404_s17 }
   0x8   : > { %p35_p0 = scmp.ge.s32.totalorder %s33_s23, 2  ;;  %p130_p1 = scmp.ne.s32.totalorder %s2404_s17, %s2400_s16 }
   0x9   : > { %p131_p2 = scmp.eq.s32.totalorder %s1804_s21, 1  ;;  %p136_p3 = scmp.ne.s32.totalorder %s2400_s16, %s2396_s15 }
   0xa   : > { %s2862_s23 = smov (%p35_p0, %s33_s23), 0  ;;  %p137_p5 = scmp.eq.s32.totalorder %s1805_s22, 1 }
   0xb   : > { %p2487_p4 = por %p131_p2, %p130_p1  ;;  %s115_s26 = ssub.s32 %s2412_s19, %s2862_s23 }
   0xc   : > { %p1810_p6 = scmp.ge.s32.totalorder %s2416_s20, 1  ;;  %p118_p7 = scmp.eq.s32.totalorder %s115_s26, 0 }
   0xd   : > { %p2494_p8 = por %p137_p5, %p136_p3  ;;  %p204_p9 = scmp.lt.s32.totalorder %s2416_s20, 3 }
   0xe   : > { %s2500_s28 = scalar_select %p118_p7, %s2404_s17, %s120_s24  }
   0xf   : > { %p205_p10 = pnand %p1810_p6, %p204_p9 }
  0x10   : > { %v1822_v0 = vld [vmem:[%s2850_s1 + $0x4] sm:$0xf] (!%p205_p10)  ;;  %vm299_vm0 = vcmask (!%p205_p10), 1043456   ;;  %v2508_v1 = vld [vmem:[%s2850_s1 + $0x10] sm:$0xf] (!%p205_p10)  ;;  %p242_p11 = scmp.lt.s32.totalorder (!%p205_p10), %s2408_s18, 1 }
  0x11   : > { %208 = sbr.rel (%p205_p10) target bundleno = 356 (0x164), region = 32  ;;  %2051 = vmatprep.subr.msk.mxu1 (!%p205_p10), %vm299_vm0, %v1822_v0  ;;  %2107 = vmatprep.subr.msk.mxu0 (!%p205_p10), %vm299_vm0, %v2508_v1  ;;  %v262_v2 = vld [vmem:[%s2850_s1] sm:$0xf] (!%p205_p10)  ;;  %v1895_v3 = vld [vmem:[%s2850_s1 + $0x14] sm:$0xf] (!%p205_p10)  ;;  %vm274_vm1 = vcmask (!%p205_p10), 31744  }
  0x12   : > { %2052 = vmatpush3.msk.msra.mxu1 (!%p205_p10), %vm299_vm0, %v1822_v0  ;;  %2108 = vmatpush3.msk.msra.mxu0 (!%p205_p10), %vm299_vm0, %v2508_v1  ;;  %v1913_v10 = vld [vmem:[%s2850_s1 + $0x18] sm:$0xf] (!%p205_p10)  ;;  %v1841_v11 = vld [vmem:[%s2850_s1 + $0x8] sm:$0xf] (!%p205_p10)  ;;  %v1931_v20 = vld [vmem:[%s2850_s1 + $0x1c] sm:$0xf] (!%p205_p10) }
  0x13   : > { %2065 = vmatprep.subr.msk.mxu1 (!%p205_p10), %vm299_vm0, %v262_v2  ;;  %2121 = vmatprep.subr.msk.mxu0 (!%p205_p10), %vm299_vm0, %v1895_v3  ;;  %v1859_v29 = vld [vmem:[%s2850_s1 + $0xc] sm:$0xf] (!%p205_p10)  ;;  %v1949_v35 = vld [vmem:[%s2850_s1 + $0x20] sm:$0xf] (!%p205_p10)  ;;  %s2714_s10 = sand.u32 (!%p205_p10), 1, %s2400_s16   ;;  %vm1609_vm2 = vcmask (!%p205_p10), 64512  }
  0x14   : > { %s1968_s22 = sshll.u32 (!%p205_p10), %s2408_s18, 10  ;;  %s1635_s8 = scalar_lea.sflag (!%p205_p10), [#allocation3], %s2714_s10 }
  0x15   : > { %s2749_s29 = scalar_lea.hbm (!%p205_p10), %s2852_s3, %s1968_s22  ;;  %s2765_s7 = scalar_lea.hbm (!%p205_p10), %s2853_s4, %s1968_s22 }
  0x18   : > { %s243_s11 = scalar_select %p242_p11, %s2408_s18, 1 }
  0x1a   : > { %s2243_s12 = smul.u32 576, %s243_s11  ;;  %s1811_s11 = sshll.u32 %s2714_s10, 6 }
  0x1b   : > { %s2720_s14 = scalar_lea.vmem [#allocation2], %s1811_s11 }
  0x1c   : > { %s2529_s21 = scalar_lea.vmem %s2849_s0, %s2243_s12  ;;  %s1654_s24 = sshll.u32 %s2720_s14, 4  ;;  %s2753_s24 = int_to_ptr.vmem [resolvable:$true] %s1654_s24 }
  0x1d   : > { %v1814_v4 = vld [vmem:[%s2529_s21 + $0x90] sm:$0xff]  ;;  %v2534_v6 = vld [vmem:[%s2529_s21 + $0xa0] sm:$0xff]  ;;  %s2306_s9 = scalar_lea.vmem %s2753_s24, 1024 }
  0x1e   : > { %v1869_v5 = vld [vmem:[%s2529_s21 + $0x1b0] sm:$0xff]  ;;  %2053 = vmatprep.mubr.msk.f32.mxu1 %vm274_vm1, %v1814_v4  ;;  %v1870_v7 = vld [vmem:[%s2529_s21 + $0x1c0] sm:$0xff]  ;;  %p2307_p12 = scmp.ne.s32.totalorder %s2753_s24, %s2306_s9 }
  0x1f   : > { %2109 = vmatprep.mubr.msk.f32.mxu0 %vm274_vm1, %v1869_v5  ;;  %v2540_v8 = vld [vmem:[%s2529_s21 + $0xb0] sm:$0xff]  ;;  %2054 = vmatmul.mubr.msk.f32.vlgmr.msra.gmra.mrb[0].mxu1 %vm274_vm1, %v2534_v6  ;;  %v2555_v12 = vld [vmem:[%s2529_s21 + $0xc0] sm:$0xff] }
  0x20   : > { %v1871_v9 = vld [vmem:[%s2529_s21 + $0x1d0] sm:$0xff]  ;;  %2110 = vmatmul.mubr.msk.f32.vlgmr.msra.gmra.mrb[0].mxu0 %vm274_vm1, %v1870_v7  ;;  %2066 = vmatpush3.msk.msra.mxu1 %vm299_vm0, %v262_v2  ;;  %v1872_v13 = vld [vmem:[%s2529_s21 + $0x1e0] sm:$0xff]  ;;  %p2308_p13 = pnand %p2307_p12, %p2487_p4 }
  0x21   : > { %2122 = vmatpush3.msk.msra.mxu0 %vm299_vm0, %v1895_v3  ;;  %2056 = vmatprep.mubr.msk.f32.mxu1 %vm274_vm1, %v2540_v8  ;;  %v2562_v14 = vld [vmem:[%s2529_s21 + $0xd0] sm:$0xff]  ;;  %v1887_v15 = vld [vmem:[%s2529_s21 + $0x121] sm:$0xff] }
  0x22   : > { %2112 = vmatprep.mubr.msk.f32.mxu0 %vm274_vm1, %v1871_v9  ;;  %2135 = vmatprep.subr.msk.mxu0 %vm299_vm0, %v1913_v10  ;;  %v2574_v16 = vld [vmem:[%s2529_s21 + $0xe0] sm:$0xff]  ;;  %v1888_v17 = vld [vmem:[%s2529_s21 + $0x131] sm:$0xff]  ;;  %p2309_p0 = pneg %p2308_p13 }
  0x23   : > { %2079 = vmatprep.subr.msk.mxu1 %vm299_vm0, %v1841_v11  ;;  %2057 = vmatmul.mubr.msk.f32.gmra.mrb[2].mxu1 %vm274_vm1, %v2555_v12  ;;  %v2578_v18 = vld [vmem:[%s2529_s21 + $0xf0] sm:$0xff]  ;;  %v1889_v19 = vld [vmem:[%s2529_s21 + $0x141] sm:$0xff] }
  0x24   : > { %2113 = vmatmul.mubr.msk.f32.gmra.mrb[2].mxu0 %vm274_vm1, %v1872_v13  ;;  %2059 = vmatprep.mubr.msk.f32.mxu1 %vm274_vm1, %v2562_v14  ;;  %v2591_v21 = vld [vmem:[%s2529_s21 + $0x100] sm:$0xff]  ;;  %v1890_v22 = vld [vmem:[%s2529_s21 + $0x151] sm:$0xff] }
  0x25   : > { %2123 = vmatprep.mubr.msk.f32.mxu0 %vm274_vm1, %v1887_v15  ;;  %v254_v23 = vld [vmem:[%s2529_s21] sm:$0xff]  ;;  %v255_v25 = vld [vmem:[%s2529_s21 + $0x10] sm:$0xff] }
  0x26   : > { %v1891_v24 = vld [vmem:[%s2529_s21 + $0x161] sm:$0xff]  ;;  %v1892_v26 = vld [vmem:[%s2529_s21 + $0x171] sm:$0xff] }
  0x27   : > { %2060 = vmatmul.mubr.msk.f32.gmra.mrb[4].mxu1 %vm274_vm1, %v2574_v16  ;;  %v256_v27 = vld [vmem:[%s2529_s21 + $0x20] sm:$0xff]  ;;  %v257_v30 = vld [vmem:[%s2529_s21 + $0x30] sm:$0xff] }
  0x28   : > { %2124 = vmatmul.mubr.msk.f32.vlgmr.msra.gmra.mrb[0].mxu0 %vm274_vm1, %v1888_v17  ;;  %2062 = vmatprep.mubr.msk.f32.mxu1 %vm274_vm1, %v2578_v18  ;;  %v1893_v28 = vld [vmem:[%s2529_s21 + $0x181] sm:$0xff]  ;;  %v1894_v31 = vld [vmem:[%s2529_s21 + $0x191] sm:$0xff] }
  0x29   : > { %2136 = vmatpush3.msk.msra.mxu0 %vm299_vm0, %v1913_v10  ;;  %2126 = vmatprep.mubr.msk.f32.mxu0 %vm274_vm1, %v1889_v19  ;;  %v258_v32 = vld [vmem:[%s2529_s21 + $0x40] sm:$0xff]  ;;  %v259_v33 = vld [vmem:[%s2529_s21 + $0x50] sm:$0xff] }
  0x2a   : > { %2149 = vmatprep.subr.msk.mxu0 %vm299_vm0, %v1931_v20  ;;  %v260_v34 = vld [vmem:[%s2529_s21 + $0x60] sm:$0xff]  ;;  %v261_v36 = vld [vmem:[%s2529_s21 + $0x70] sm:$0xff] }
  0x2b   : > { %2063 = vmatmul.mubr.msk.f32.gmra.mrb[6].mxu1 %vm274_vm1, %v2591_v21  ;;  %v540_v37 = vld [vmem:[%s2529_s21 + $0x1] sm:$0xff]  ;;  %v541_v38 = vld [vmem:[%s2529_s21 + $0x11] sm:$0xff] }
  0x2c   : > { %2127 = vmatmul.mubr.msk.f32.gmra.mrb[2].mxu0 %vm274_vm1, %v1890_v22  ;;  %2067 = vmatprep.mubr.msk.f32.mxu1 %vm274_vm1, %v254_v23  ;;  %v542_v39 = vld [vmem:[%s2529_s21 + $0x21] sm:$0xff]  ;;  %v543_v40 = vld [vmem:[%s2529_s21 + $0x31] sm:$0xff] }
  0x2d   : > { %2129 = vmatprep.mubr.msk.f32.mxu0 %vm274_vm1, %v1891_v24  ;;  %v1912_v41 = vld [vmem:[%s2529_s21 + $0x80] sm:$0xff]  ;;  %v545_v43 = vld [vmem:[%s2529_s21 + $0x51] sm:$0xff] }
  0x2e   : > { %v544_v42 = vld [vmem:[%s2529_s21 + $0x41] sm:$0xff]  ;;  %v547_v45 = vld [vmem:[%s2529_s21 + $0x71] sm:$0xff] }
  0x2f   : > { %2068 = vmatmul.mubr.msk.f32.vlgmr.msra.gmra.mrb[0].mxu1 %vm274_vm1, %v255_v25  ;;  %v546_v44 = vld [vmem:[%s2529_s21 + $0x61] sm:$0xff]  ;;  %v1852_v47 = vld [vmem:[%s2529_s21 + $0x130] sm:$0xff] }
  0x30   : > { %2130 = vmatmul.mubr.msk.f32.gmra.mrb[4].mxu0 %vm274_vm1, %v1892_v26  ;;  %2080 = vmatpush3.msk.msra.mxu1 %vm299_vm0, %v1841_v11  ;;  %v1851_v46 = vld [vmem:[%s2529_s21 + $0x120] sm:$0xff]  ;;  %v1854_v49 = vld [vmem:[%s2529_s21 + $0x150] sm:$0xff] }
  0x31   : > { %2070 = vmatprep.mubr.msk.f32.mxu1 %vm274_vm1, %v256_v27  ;;  %2132 = vmatprep.mubr.msk.f32.mxu0 %vm274_vm1, %v1893_v28  ;;  %v1853_v48 = vld [vmem:[%s2529_s21 + $0x140] sm:$0xff]  ;;  %v1930_v50 = vld [vmem:[%s2529_s21 + $0x110] sm:$0xff] }
  0x32   : > { %2093 = vmatprep.subr.msk.mxu1 %vm299_vm0, %v1859_v29  ;;  %v1855_v51 = vld [vmem:[%s2529_s21 + $0x160] sm:$0xff]  ;;  %v1856_v52 = vld [vmem:[%s2529_s21 + $0x170] sm:$0xff] }
  0x33   : > { %2071 = vmatmul.mubr.msk.f32.gmra.mrb[2].mxu1 %vm274_vm1, %v257_v30  ;;  %v1857_v53 = vld [vmem:[%s2529_s21 + $0x180] sm:$0xff]  ;;  %v1858_v54 = vld [vmem:[%s2529_s21 + $0x190] sm:$0xff] }
  0x34   : > { %2133 = vmatmul.mubr.msk.f32.gmra.mrb[6].mxu0 %vm274_vm1, %v1894_v31  ;;  %2073 = vmatprep.mubr.msk.f32.mxu1 %vm274_vm1, %v258_v32  ;;  %v1873_v55 = vld [vmem:[%s2529_s21 + $0x1f0] sm:$0xff]  ;;  %v1874_v56 = vld [vmem:[%s2529_s21 + $0x200] sm:$0xff] }
  0x35   : > { %2137 = vmatprep.mubr.msk.f32.mxu0 %vm274_vm1, %v255_v25  ;;  %v1875_v57 = vld [vmem:[%s2529_s21 + $0x210] sm:$0xff]  ;;  %v1876_v58 = vld [vmem:[%s2529_s21 + $0x220] sm:$0xff] }
  0x36   : > { %v1948_v59 = vld [vmem:[%s2529_s21 + $0x81] sm:$0xff]  ;;  %s2726_s21 = scalar_lea.vmem [#allocation4], %s1811_s11  ;;  %s2418_s11 = smov [#allocation2]  }
  0x37   : > { %2074 = vmatmul.mubr.msk.f32.gmra.mrb[4].mxu1 %vm274_vm1, %v259_v33  ;;  %s1671_s30 = sshll.u32 %s2726_s21, 4  ;;  %s2310_s12 = sshll.u32 %s2418_s11, 4  ;;  %s2767_s30 = int_to_ptr.vmem [resolvable:$true] %s1671_s30  ;;  %s2311_s12 = int_to_ptr.vmem [resolvable:$false] %s2310_s12 }
  0x38   : > { %2138 = vmatmul.mubr.msk.f32.vlgmr.msra.gmra.mrb[0].mxu0 %vm274_vm1, %v256_v27  ;;  %2076 = vmatprep.mubr.msk.f32.mxu1 %vm274_vm1, %v260_v34  ;;  %s2312_s13 = scalar_lea.vmem %s2311_s12, 2048  ;;  %p2313_p1 = scmp.lt.s32.totalorder %s2753_s24, %s2311_s12 }
  0x39   : > { %2150 = vmatpush3.msk.msra.mxu0 %vm299_vm0, %v1931_v20  ;;  %2140 = vmatprep.mubr.msk.f32.mxu0 %vm274_vm1, %v257_v30  ;;  %p2314_p2 = scmp.lt.s32.totalorder %s2312_s13, %s2306_s9 }
  0x3a   : > { %2163 = vmatprep.subr.msk.mxu0 %vm299_vm0, %v1949_v35 }
  0x3b   : > { %2077 = vmatmul.mubr.msk.f32.gmra.mrb[6].mxu1 %vm274_vm1, %v261_v36  ;;  %p2315_p3 = por %p2314_p2, %p2313_p1 }
  0x3c   : > { %2141 = vmatmul.mubr.msk.f32.gmra.mrb[2].mxu0 %vm274_vm1, %v258_v32  ;;  %2081 = vmatprep.mubr.msk.f32.mxu1 %vm274_vm1, %v540_v37 }
  0x3d   : > { %2143 = vmatprep.mubr.msk.f32.mxu0 %vm274_vm1, %v259_v33  ;;  %p2316_p5 = pnand %p2315_p3, %p2309_p0 }
  0x3f   : > { %2082 = vmatmul.mubr.msk.f32.vlgmr.msra.gmra.mrb[0].mxu1 %vm274_vm1, %v541_v38 }
  0x40   : > { %2144 = vmatmul.mubr.msk.f32.gmra.mrb[4].mxu0 %vm274_vm1, %v260_v34  ;;  %2094 = vmatpush3.msk.msra.mxu1 %vm299_vm0, %v1859_v29 }
  0x41   : > { %2084 = vmatprep.mubr.msk.f32.mxu1 %vm274_vm1, %v542_v39  ;;  %2146 = vmatprep.mubr.msk.f32.mxu0 %vm274_vm1, %v261_v36 }
  0x42   : > { %2177 = vmatprep.subr.msk.mxu1 %vm299_vm0, %v2508_v1 }
  0x43   : > { %2085 = vmatmul.mubr.msk.f32.gmra.mrb[2].mxu1 %vm274_vm1, %v543_v40 }
  0x44   : > { %2147 = vmatmul.mubr.msk.f32.gmra.mrb[6].mxu0 %vm274_vm1, %v1912_v41  ;;  %2087 = vmatprep.mubr.msk.f32.mxu1 %vm274_vm1, %v544_v42 }
  0x45   : > { %2151 = vmatprep.mubr.msk.f32.mxu0 %vm274_vm1, %v2534_v6 }
  0x47   : > { %2088 = vmatmul.mubr.msk.f32.gmra.mrb[4].mxu1 %vm274_vm1, %v545_v43 }
  0x48   : > { %2152 = vmatmul.mubr.msk.f32.vlgmr.msra.gmra.mrb[0].mxu0 %vm274_vm1, %v2540_v8  ;;  %2090 = vmatprep.mubr.msk.f32.mxu1 %vm274_vm1, %v546_v44 }
  0x49   : > { %2164 = vmatpush3.msk.msra.mxu0 %vm299_vm0, %v1949_v35  ;;  %2154 = vmatprep.mubr.msk.f32.mxu0 %vm274_vm1, %v2555_v12 }
  0x4b   : > { %2091 = vmatmul.mubr.msk.f32.gmra.mrb[6].mxu1 %vm274_vm1, %v547_v45 }
  0x4c   : > { %2155 = vmatmul.mubr.msk.f32.gmra.mrb[2].mxu0 %vm274_vm1, %v2562_v14  ;;  %2095 = vmatprep.mubr.msk.f32.mxu1 %vm274_vm1, %v1851_v46 }
  0x4d   : > { %2157 = vmatprep.mubr.msk.f32.mxu0 %vm274_vm1, %v2574_v16 }
  0x4f   : > { %2096 = vmatmul.mubr.msk.f32.vlgmr.msra.gmra.mrb[0].mxu1 %vm274_vm1, %v1852_v47 }
  0x50   : > { %2158 = vmatmul.mubr.msk.f32.gmra.mrb[4].mxu0 %vm274_vm1, %v2578_v18  ;;  %2178 = vmatpush3.msk.msra.mxu1 %vm299_vm0, %v2508_v1  ;;  %v1959_v1 = vld [vmem:[%s2851_s2] ss:$0 sm:$0xff] }
  0x51   : > { %2098 = vmatprep.mubr.msk.f32.mxu1 %vm274_vm1, %v1853_v48  ;;  %2160 = vmatprep.mubr.msk.f32.mxu0 %vm274_vm1, %v2591_v21 }
  0x53   : > { %2099 = vmatmul.mubr.msk.f32.gmra.mrb[2].mxu1 %vm274_vm1, %v1854_v49 }
  0x54   : > { %2161 = vmatmul.mubr.msk.f32.gmra.mrb[6].mxu0 %vm274_vm1, %v1930_v50  ;;  %2101 = vmatprep.mubr.msk.f32.mxu1 %vm274_vm1, %v1855_v51 }
  0x55   : > { %2165 = vmatprep.mubr.msk.f32.mxu0 %vm274_vm1, %v541_v38 }
  0x57   : > { %2102 = vmatmul.mubr.msk.f32.gmra.mrb[4].mxu1 %vm274_vm1, %v1856_v52 }
  0x58   : > { %2166 = vmatmul.mubr.msk.f32.vlgmr.msra.gmra.mrb[0].mxu0 %vm274_vm1, %v542_v39  ;;  %2104 = vmatprep.mubr.msk.f32.mxu1 %vm274_vm1, %v1857_v53 }
  0x59   : > { %2168 = vmatprep.mubr.msk.f32.mxu0 %vm274_vm1, %v543_v40 }
  0x5b   : > { %2105 = vmatmul.mubr.msk.f32.gmra.mrb[6].mxu1 %vm274_vm1, %v1858_v54 }
  0x5c   : > { %2169 = vmatmul.mubr.msk.f32.gmra.mrb[2].mxu0 %vm274_vm1, %v544_v42  ;;  %2115 = vmatprep.mubr.msk.f32.mxu1 %vm274_vm1, %v1873_v55 }
  0x5d   : > { %2171 = vmatprep.mubr.msk.f32.mxu0 %vm274_vm1, %v545_v43 }
  0x5f   : > { %2116 = vmatmul.mubr.msk.f32.vlgmr.msra.gmra.mrb[4].mxu1 %vm274_vm1, %v1874_v56 }
  0x60   : > { %2172 = vmatmul.mubr.msk.f32.gmra.mrb[4].mxu0 %vm274_vm1, %v546_v44  ;;  %2118 = vmatprep.mubr.msk.f32.mxu1 %vm274_vm1, %v1875_v57 }
  0x61   : > { %2174 = vmatprep.mubr.msk.f32.mxu0 %vm274_vm1, %v547_v45 }
  0x63   : > { %2119 = vmatmul.mubr.msk.f32.gmra.mrb[6].mxu1 %vm274_vm1, %v1876_v58 }
  0x64   : > { %2175 = vmatmul.mubr.msk.f32.gmra.mrb[6].mxu0 %vm274_vm1, %v1948_v59 }
 0x122   : > { %v2097_v60 = vpop.f32.mrb[0].mxu1 }
 0x123   : > { %v794_v61 = vpop.f32.mrb[1].mxu1 }
 0x126   : > { %v2100_v62 = vpop.f32.mrb[2].mxu1 }
 0x127   : > { %v804_v63 = vpop.f32.mrb[3].mxu1 }
 0x12b   : > { %v2167_v0 = vpop.f32.mrb[0].mxu0 }
 0x12c   : > { %v2179_v2 = vadd.f32 %v2167_v0, %v2097_v60  ;;  %v1547_v3 = vpop.f32.mrb[1].mxu0 }
 0x12d   : > { %v2180_v4 = vadd.f32 %v1547_v3, %v794_v61 }
 0x12e   : > { %v1602_v5 = vadd.f32 %v2179_v2, %v1959_v1 }
 0x12f   : > { %v1601_v6 = vadd.f32 %v2180_v4, %v1959_v1  ;;  %v2170_v7 = vpop.f32.mrb[2].mxu0 }
 0x130   : > { %1611 = vst.msk [vmem:[%s2720_s14 + $0x8] sm:$0xff] %vm1609_vm2, %v1602_v5  ;;  %v1619_v8 = vmax.f32 %v1602_v5, 0.0  ;;  %v2181_v9 = vadd.f32 %v2170_v7, %v2100_v62  ;;  %v1557_v10 = vpop.f32.mrb[3].mxu0 }
 0x131   : > { %1610 = vst.msk [vmem:[%s2720_s14] sm:$0xff] %vm1609_vm2, %v1601_v6  ;;  %v1618_v11 = vmax.f32 %v1601_v6, 0.0  ;;  %v2182_v12 = vadd.f32 %v1557_v10, %v804_v63 }
 0x132   : > { %1627 = vst.msk [vmem:[%s2726_s21 + $0x8] sm:$0xff] %vm1609_vm2, %v1619_v8  ;;  %v1604_v13 = vadd.f32 %v2181_v9, %v1959_v1  ;;  %v2117_v15 = vpop.f32.mrb[4].mxu1 }
 0x133   : > { %1626 = vst.msk [vmem:[%s2726_s21] sm:$0xff] %vm1609_vm2, %v1618_v11  ;;  %v1603_v14 = vadd.f32 %v2182_v12, %v1959_v1  ;;  %v2173_v16 = vpop.f32.mrb[4].mxu0  ;;  %v965_v19 = vpop.f32.mrb[5].mxu1 }
 0x134   : > { %1613 = vst.msk [vmem:[%s2720_s14 + $0x18] sm:$0xff] %vm1609_vm2, %v1604_v13  ;;  %v1621_v17 = vmax.f32 %v1604_v13, 0.0  ;;  %v2183_v18 = vadd.f32 %v2173_v16, %v2117_v15  ;;  %v1567_v20 = vpop.f32.mrb[5].mxu0 }
 0x135   : > { %1612 = vst.msk [vmem:[%s2720_s14 + $0x10] sm:$0xff] %vm1609_vm2, %v1603_v14  ;;  %v1620_v21 = vmax.f32 %v1603_v14, 0.0  ;;  %v2184_v22 = vadd.f32 %v1567_v20, %v965_v19 }
 0x136   : > { %1629 = vst.msk [vmem:[%s2726_s21 + $0x18] sm:$0xff] %vm1609_vm2, %v1621_v17  ;;  %v1606_v23 = vadd.f32 %v2183_v18, %v1959_v1  ;;  %v2120_v25 = vpop.f32.mrb[6].mxu1 }
 0x137   : > { %1628 = vst.msk [vmem:[%s2726_s21 + $0x10] sm:$0xff] %vm1609_vm2, %v1620_v21  ;;  %v1605_v24 = vadd.f32 %v2184_v22, %v1959_v1  ;;  %v2176_v26 = vpop.f32.mrb[6].mxu0  ;;  %v975_v29 = vpop.f32.mrb[7].mxu1 }
 0x138   : > { %1615 = vst.msk [vmem:[%s2720_s14 + $0x28] sm:$0xff] %vm1609_vm2, %v1606_v23  ;;  %v1623_v27 = vmax.f32 %v1606_v23, 0.0  ;;  %v2185_v28 = vadd.f32 %v2176_v26, %v2120_v25  ;;  %v1577_v30 = vpop.f32.mrb[7].mxu0 }
 0x139   : > { %1614 = vst.msk [vmem:[%s2720_s14 + $0x20] sm:$0xff] %vm1609_vm2, %v1605_v24  ;;  %v1622_v31 = vmax.f32 %v1605_v24, 0.0  ;;  %v2186_v32 = vadd.f32 %v1577_v30, %v975_v29 }
 0x13a   : > { %1631 = vst.msk [vmem:[%s2726_s21 + $0x28] sm:$0xff] %vm1609_vm2, %v1623_v27  ;;  %v1608_v33 = vadd.f32 %v2185_v28, %v1959_v1 }
 0x13b   : > { %1630 = vst.msk [vmem:[%s2726_s21 + $0x20] sm:$0xff] %vm1609_vm2, %v1622_v31  ;;  %v1607_v34 = vadd.f32 %v2186_v32, %v1959_v1 }
 0x13c   : > { %1617 = vst.msk [vmem:[%s2720_s14 + $0x38] sm:$0xff] %vm1609_vm2, %v1608_v33  ;;  %v1625_v35 = vmax.f32 %v1608_v33, 0.0 }
 0x13d   : > { %1616 = vst.msk [vmem:[%s2720_s14 + $0x30] sm:$0xff] %vm1609_vm2, %v1607_v34  ;;  %v1624_v36 = vmax.f32 %v1607_v34, 0.0 }
 0x13e   : > { %1633 = vst.msk [vmem:[%s2726_s21 + $0x38] sm:$0xff] %vm1609_vm2, %v1625_v35 }
 0x13f   : > { %2319 = shalt.err (!%p2316_p5)
}
 0x140   : > { %s2320_s14 = scalar_lea.hbm %s2749_s29, 1024  ;;  %s2324_s26 = scalar_lea.hbm %s2852_s3, 2048 }
 0x141   : > { %p2321_p6 = scmp.ne.s32.totalorder %s2749_s29, %s2320_s14  ;;  %p2325_p10 = scmp.lt.u32.totalorder %s2749_s29, %s2852_s3 }
 0x142   : > { %p2326_p11 = scmp.lt.u32.totalorder %s2324_s26, %s2320_s14  ;;  %p2328_p13 = scmp.lt.u32.totalorder %s2320_s14, %s2749_s29 }
 0x143   : > { %p2322_p7 = pnand %p2321_p6, %p2487_p4 }
 0x144   : > { %p2327_p12 = por %p2326_p11, %p2325_p10 }
 0x145   : > { %p2323_p9 = pneg %p2322_p7 }
 0x146   : > { %p2329_p0 = por %p2328_p13, %p2327_p12 }
 0x148   : > { %p2330_p1 = pnand %p2329_p0, %p2323_p9 }
 0x14a   : > { %2333 = shalt.err (!%p2330_p1)
}
 0x14b   : > { %s2419_s9 = smov 128   ;;  %s2420_s11 = smov 8   ;;  %1632 = vst.msk [vmem:[%s2726_s21 + $0x30] sm:$0xff] %vm1609_vm2, %v1624_v36 }
 0x14c   : > { %2244 = dma.vmem_to_hbm [thread:$0]  (%p2487_p4), %s2753_s24, 1024, %s2749_s29, %s1635_s8, %s2419_s9, %s2419_s9, %s2420_s11  }
 0x14d   : > { %s1640_s12 = scalar_lea.sflag [#allocation5], %s2714_s10  ;;  %s2334_s13 = scalar_lea.vmem %s2767_s30, 1024 }
 0x14e   : > { %p2335_p2 = scmp.ne.s32.totalorder %s2767_s30, %s2334_s13  ;;  %s2421_s14 = smov [#allocation4]  }
 0x14f   : > { %s2338_s22 = sshll.u32 %s2421_s14, 4  ;;  %s2339_s22 = int_to_ptr.vmem [resolvable:$false] %s2338_s22 }
 0x150   : > { %p2336_p3 = pnand %p2335_p2, %p2487_p4  ;;  %s2340_s18 = scalar_lea.vmem %s2339_s22, 2048 }
 0x151   : > { %p2341_p6 = scmp.lt.s32.totalorder %s2767_s30, %s2339_s22  ;;  %p2342_p7 = scmp.lt.s32.totalorder %s2340_s18, %s2334_s13 }
 0x152   : > { %p2337_p5 = pneg %p2336_p3 }
 0x153   : > { %p2343_p9 = por %p2342_p7, %p2341_p6 }
 0x155   : > { %p2344_p10 = pnand %p2343_p9, %p2337_p5 }
 0x157   : > { %2347 = shalt.err (!%p2344_p10)
}
 0x158   : > { %s2348_s21 = scalar_lea.hbm %s2765_s7, 1024  ;;  %s2352_s8 = scalar_lea.hbm %s2853_s4, 2048 }
 0x159   : > { %p2349_p11 = scmp.ne.s32.totalorder %s2765_s7, %s2348_s21  ;;  %p2353_p0 = scmp.lt.u32.totalorder %s2765_s7, %s2853_s4 }
 0x15a   : > { %p2354_p1 = scmp.lt.u32.totalorder %s2352_s8, %s2348_s21  ;;  %p2356_p3 = scmp.lt.u32.totalorder %s2348_s21, %s2765_s7 }
 0x15b   : > { %p2350_p12 = pnand %p2349_p11, %p2487_p4 }
 0x15c   : > { %p2355_p2 = por %p2354_p1, %p2353_p0 }
 0x15d   : > { %p2351_p13 = pneg %p2350_p12 }
 0x15e   : > { %p2357_p5 = por %p2356_p3, %p2355_p2 }
 0x160   : > { %p2358_p6 = pnand %p2357_p5, %p2351_p13 }
 0x162   : > { %2361 = shalt.err (!%p2358_p6)
}
 0x163   : > { %2245 = dma.vmem_to_hbm [thread:$0]  (%p2487_p4), %s2767_s30, 1024, %s2765_s7, %s1640_s12, %s2419_s9, %s2419_s9, %s2420_s11  }
 0x164 PF: > { %p2255_p7 = scmp.ge.s32.totalorder %s2416_s20, 2  ;;  %s1686_s6 = sand.u32 1, %s2396_s15  }
 0x165   : > { %s1687_s13 = scalar_lea.sflag [#allocation3], %s1686_s6 }
 0x166   : > { %p2249_p9 = pnand %p2255_p7, %p2494_p8 }
 0x168   : > { %2387 = dma.done.wait (!%p2249_p9), %s1687_s13, 1024  }
 0x169   : > { %2389 = vsyncadd (!%p2249_p9), %s1687_s13, 4294966272  ;;  %s1696_s25 = scalar_lea.sflag [#allocation5], %s1686_s6 }
 0x16a   : > { %2391 = dma.done.wait (!%p2249_p9), %s1696_s25, 1024  }
 0x16b   : > { %2393 = vsyncadd (!%p2249_p9), %s1696_s25, 4294966272  ;;  %s21_s20 = sadd.s32 1, %s2416_s20   ;;  %s2856_s15 = smov %s2400_s16 }
 0x16c   : > { %p18_p10 = scmp.ge.s32.totalorder %s21_s20, 4   ;;  %s2857_s16 = smov %s2404_s17 }
 0x16d   : > { %s2858_s17 = smov %s2500_s28  ;;  %s2859_s18 = smov %s2412_s19 }
 0x16e   : > { %s2860_s19 = smov %s2862_s23  ;;  %20 = sbr.rel (!%p18_p10) target bundleno = 6 (0x6), region = 103 }
 0x175   :  { %1701 = vsyncpa [#allocation3], 1 }
 0x176   :  { %1703 = vsyncpa [#allocation3 + $0x1], 1 }
 0x177   :  { %1704 = vsyncpa [#allocation5], 1 }
 0x178   :  { %1706 = vsyncpa [#allocation5 + $0x1], 1 }

</bundles_post_ra>
